<compile_context>
chip_gen: v5e
topology: v5e:2x2
jax: 0.10.0
libtpu: 0.0.40
codegen_flags: <defaults>
</compile_context>

<pallas_src>
import functools
import math

import jax
import jax.numpy as jnp
from jax.experimental import pallas as pl
from jax.experimental.pallas import tpu as pltpu

_MAX_LANE_TILE = 65536                 # upper bound on lane tile (mult of 128)
_VMEM_BUDGET = 40 * 1024 * 1024        # double-buffered streamed blocks (v7x-safe)
_VMEM_LIMIT = 48 * 1024 * 1024         # scoped VMEM limit passed to Mosaic


def _choose_pack(feat, batch):
    """Largest sublane pack factor (<=32) dividing the feature count so the
    (B, F) -> (B*pack, F/pack) reshape is a free, contiguous bitcast."""
    for p in (32, 16, 8, 4, 2, 1):
        if feat % p == 0 and batch * p <= 512:
            return p
    return 1


def _plan_tiles(row_w, sub_rows, bytes_per_elem, max_lane_tile):
    """Pick the lane tile: as large as the VMEM budget allows (double-buffered
    gts+preds+mask blocks); a single full-width tile if the row already fits."""
    bytes_per_lane = 2 * bytes_per_elem * sub_rows
    cap = (_VMEM_BUDGET // bytes_per_lane) // 128 * 128
    cap = max(128, min(max_lane_tile, cap))
    if row_w <= cap:
        return row_w, 1, False                       # one full-width tile
    num_tiles = -(-row_w // cap)
    return cap, num_tiles, (row_w % cap != 0)        # mask the ragged tail


def _make_kernel(tile, row_w, need_tail_mask):
    def kernel(gts_ref, preds_ref, mask_ref, out_ref):
        k = pl.program_id(1)

        @pl.when(k == 0)
        def _init():
            out_ref[...] = jnp.zeros_like(out_ref)

        g = gts_ref[...].astype(jnp.float32)         # (sb, tile)
        p = preds_ref[...].astype(jnp.float32)
        m = mask_ref[...].astype(jnp.float32)

        if need_tail_mask:
            # Zero out-of-range lanes of the partial last block (select, so
            # garbage / NaN reads cannot poison the sums).
            col = k * tile + jax.lax.broadcasted_iota(jnp.int32, g.shape, 1)
            valid = col < row_w
            zero = jnp.float32(0.0)
            g = jnp.where(valid, g, zero)
            p = jnp.where(valid, p, zero)
            m = jnp.where(valid, m, zero)

        # `gts.type(torch.int32) == 1` (truncation) == [1.0 <= g < 2.0] for the
        # non-negative labels this module expects; avoids an int round-trip.
        g1 = jnp.logical_and(g >= 1.0, g < 2.0).astype(jnp.float32)
        err = p - g

        out_ref[...] += jnp.concatenate(
            [jnp.sum(g1, axis=1, keepdims=True),
             jnp.sum(m, axis=1, keepdims=True),
             jnp.sum(g1 * m, axis=1, keepdims=True),
             jnp.sum(err * err, axis=1, keepdims=True)],
            axis=1)

    return kernel


@functools.partial(jax.jit, static_argnames=("max_lane_tile",))
def eval_measure(gts, preds, preds_mask, video_ids, *,
                 max_lane_tile=_MAX_LANE_TILE):
    """gts/preds/preds_mask: (B, C, H, W); video_ids: (B, 1).

    Returns (B, 6) float32 rows: (tp, fp, tn, fn, loss, video_id).
    Assumes binary gts / preds_mask (values in {0, 1}).
    """
    batch = gts.shape[0]
    feat = math.prod(gts.shape[1:])
    pack = _choose_pack(feat, batch)
    bs = batch * pack
    row_w = feat // pack

    # Split the packed sublanes across both TensorCores (v7x) when the
    # per-core block keeps 8-sublane alignment; serial (and cost-neutral) on
    # single-TC chips.
    ncores = 2 if (bs % 2 == 0 and (bs // 2) % 8 == 0) else 1
    sb = bs // ncores

    bytes_per_elem = (jnp.dtype(gts.dtype).itemsize
                      + jnp.dtype(preds.dtype).itemsize
                      + jnp.dtype(preds_mask.dtype).itemsize)
    tile, num_tiles, need_tail_mask = _plan_tiles(row_w, sb, bytes_per_elem,
                                                  max_lane_tile)

    # Free, contiguous reshapes — no dtype casts, no padding copies.
    gts2 = gts.reshape(bs, row_w)
    preds2 = preds.reshape(bs, row_w)
    mask2 = preds_mask.reshape(bs, row_w)

    kernel = _make_kernel(tile, row_w, need_tail_mask)

    acc = pl.pallas_call(
        kernel,
        out_shape=jax.ShapeDtypeStruct((bs, 4), jnp.float32),
        grid_spec=pltpu.PrefetchScalarGridSpec(
            num_scalar_prefetch=0,
            grid=(ncores, num_tiles),
            in_specs=[
                pl.BlockSpec((sb, tile), lambda c, k: (c, k)),
                pl.BlockSpec((sb, tile), lambda c, k: (c, k)),
                pl.BlockSpec((sb, tile), lambda c, k: (c, k)),
            ],
            out_specs=pl.BlockSpec((sb, 4), lambda c, k: (c, 0)),
        ),
        compiler_params=pltpu.CompilerParams(
            dimension_semantics=("parallel", "arbitrary"),
            vmem_limit_bytes=_VMEM_LIMIT,
        ),
    )(gts2, preds2, mask2)

    # Tiny O(batch) epilogue: fold packed rows, derive the confusion counts.
    tot = acc.reshape(batch, pack, 4).sum(axis=1)            # (batch, 4)
    sg, sm, sgm, sl = (tot[:, i:i + 1] for i in range(4))
    tp = sgm
    fp = sm - sgm
    fn = sg - sgm
    tn = jnp.float32(feat) - sg - sm + sgm
    # TODO(synk): upstream `Loss(reduction='none')` is undefined in the source
    # module; per-sample mean-squared-error is substituted for the loss column.
    loss = sl * jnp.float32(1.0 / feat)
    vid = video_ids.reshape(batch, 1).astype(jnp.float32)
    return jnp.concatenate([tp, fp, tn, fn, loss, vid], axis=1)


def eval_measure_ref(gts, preds, preds_mask, video_ids):
    """Pure-JAX reference mirroring the PyTorch forward (XOR formulation)."""
    batch = gts.shape[0]
    gts_i = gts.astype(jnp.int32)
    mask = preds_mask.astype(jnp.int32)
    diff = jnp.bitwise_xor(gts_i, mask)
    same = jnp.bitwise_xor(diff, jnp.ones_like(diff))
    gt1 = (gts_i == 1).astype(jnp.int32)
    gt0 = (gts_i == 0).astype(jnp.int32)
    tp = (gt1 * same).reshape(batch, -1).sum(axis=1, keepdims=True)
    fp = (gt0 * diff).reshape(batch, -1).sum(axis=1, keepdims=True)
    tn = (gt0 * same).reshape(batch, -1).sum(axis=1, keepdims=True)
    fn = (gt1 * diff).reshape(batch, -1).sum(axis=1, keepdims=True)
    loss = jnp.mean((preds - gts).reshape(batch, -1) ** 2, axis=1, keepdims=True)
    return jnp.concatenate(
        [tp.astype(jnp.float32), fp.astype(jnp.float32),
         tn.astype(jnp.float32), fn.astype(jnp.float32),
         loss.astype(jnp.float32), video_ids.astype(jnp.float32)], axis=1)


def _run_case(key, shape, thresh=0.5, **kwargs):
    k_gt, k_pred = jax.random.split(key)
    batch = shape[0]
    gts = jax.random.bernoulli(k_gt, p=0.5, shape=shape).astype(jnp.float32)
    preds = jax.random.uniform(k_pred, shape, dtype=jnp.float32)
    preds_mask = (preds > thresh).astype(jnp.int32)
    video_ids = jnp.arange(batch, dtype=jnp.float32).reshape(batch, 1)

    out = jax.block_until_ready(
        eval_measure(gts, preds, preds_mask, video_ids, **kwargs))
    ref = eval_measure_ref(gts, preds, preds_mask, video_ids)
    assert out.shape == (batch, 6), out.shape
    assert jnp.allclose(out, ref, rtol=1e-5, atol=1e-5), (out, ref)


if __name__ == "__main__":
    key = jax.random.PRNGKey(0)
    k1, k2, k3 = jax.random.split(key, 3)

    # nicely-divisible case (single full-width tile, 2-core split)
    _run_case(k1, (2, 4, 16, 16))
    # odd-sized case (pack=2, single-core fallback, full-row tile)
    _run_case(k2, (2, 3, 7, 10))
    # force multi-tile + ragged-tail lane masking path with a tiny tile cap
    _run_case(k3, (2, 4, 24, 50), max_lane_tile=128)

    print("KERNEL_OK")
</pallas_src>

<mosaic_0001>
module attributes {stable_mosaic.version = 11 : i64} {
  func.func @kernel(%arg0: i32, %arg1: i32, %arg2: memref<32x32xf32, #tpu.memory_space<vmem>>, %arg3: memref<32x32xf32, #tpu.memory_space<vmem>>, %arg4: memref<32x32xi32, #tpu.memory_space<vmem>>, %arg5: memref<32x4xf32, #tpu.memory_space<vmem>>) attributes {dimension_semantics = [#tpu.dimension_semantics<parallel>, #tpu.dimension_semantics<arbitrary>], iteration_bounds = array<i64: 2, 1>, scalar_prefetch = 0 : i64, scratch_operands = 0 : i64, tpu.core_type = #tpu.core_type<tc>, window_params = [{transform_indices = @transform_0, window_bounds = array<i64: 32, 32>}, {transform_indices = @transform_1, window_bounds = array<i64: 32, 32>}, {transform_indices = @transform_2, window_bounds = array<i64: 32, 32>}, {transform_indices = @transform_3, window_bounds = array<i64: 32, 4>}]} {
    %c0_i32 = arith.constant 0 : i32
    %0 = arith.cmpi eq, %arg1, %c0_i32 : i32
    %1 = arith.extui %0 : i1 to i32
    %c0_i32_0 = arith.constant 0 : i32
    %2 = arith.cmpi ne, %1, %c0_i32_0 : i32
    scf.if %2 {
      %cst_15 = arith.constant 0.000000e+00 : f32
      %29 = vector.broadcast %cst_15 : f32 to vector<32x4xf32>
      %c0_16 = arith.constant 0 : index
      %c0_17 = arith.constant 0 : index
      %30 = vector.load %arg5[%c0_16, %c0_17] : memref<32x4xf32, #tpu.memory_space<vmem>>, vector<32x4xf32>
      tpu.vector_store %arg5[%c0_16, %c0_17], %29 {strides = array<i32>} : memref<32x4xf32, #tpu.memory_space<vmem>>, vector<32x4xf32>,
    } else {
    }
    %c0 = arith.constant 0 : index
    %c0_1 = arith.constant 0 : index
    %3 = vector.load %arg2[%c0, %c0_1] : memref<32x32xf32, #tpu.memory_space<vmem>>, vector<32x32xf32>
    %c0_2 = arith.constant 0 : index
    %c0_3 = arith.constant 0 : index
    %4 = vector.load %arg3[%c0_2, %c0_3] : memref<32x32xf32, #tpu.memory_space<vmem>>, vector<32x32xf32>
    %c0_4 = arith.constant 0 : index
    %c0_5 = arith.constant 0 : index
    %5 = vector.load %arg4[%c0_4, %c0_5] : memref<32x32xi32, #tpu.memory_space<vmem>>, vector<32x32xi32>
    %6 = arith.sitofp %5 : vector<32x32xi32> to vector<32x32xf32>
    %cst = arith.constant 1.000000e+00 : f32
    %7 = vector.broadcast %cst : f32 to vector<32x32xf32>
    %8 = arith.cmpf oge, %3, %7 : vector<32x32xf32>
    %cst_6 = arith.constant 2.000000e+00 : f32
    %9 = vector.broadcast %cst_6 : f32 to vector<32x32xf32>
    %10 = arith.cmpf olt, %3, %9 : vector<32x32xf32>
    %11 = arith.andi %8, %10 : vector<32x32xi1>
    %12 = arith.extui %11 : vector<32x32xi1> to vector<32x32xi32>
    %13 = arith.sitofp %12 : vector<32x32xi32> to vector<32x32xf32>
    %14 = arith.subf %4, %3 : vector<32x32xf32>
    %c0_7 = arith.constant 0 : index
    %c0_8 = arith.constant 0 : index
    %15 = vector.load %arg5[%c0_7, %c0_8] : memref<32x4xf32, #tpu.memory_space<vmem>>, vector<32x4xf32>
    %cst_9 = arith.constant dense<0.000000e+00> : vector<32xf32>
    %16 = vector.multi_reduction <add>, %13, %cst_9 [1] : vector<32x32xf32> to vector<32xf32>
    %17 = vector.shape_cast %16 : vector<32xf32> to vector<32x1xf32>
    %cst_10 = arith.constant dense<0.000000e+00> : vector<32xf32>
    %18 = vector.multi_reduction <add>, %6, %cst_10 [1] : vector<32x32xf32> to vector<32xf32>
    %19 = vector.shape_cast %18 : vector<32xf32> to vector<32x1xf32>
    %20 = arith.mulf %13, %6 : vector<32x32xf32>
    %cst_11 = arith.constant dense<0.000000e+00> : vector<32xf32>
    %21 = vector.multi_reduction <add>, %20, %cst_11 [1] : vector<32x32xf32> to vector<32xf32>
    %22 = vector.shape_cast %21 : vector<32xf32> to vector<32x1xf32>
    %23 = arith.mulf %14, %14 : vector<32x32xf32>
    %cst_12 = arith.constant dense<0.000000e+00> : vector<32xf32>
    %24 = vector.multi_reduction <add>, %23, %cst_12 [1] : vector<32x32xf32> to vector<32xf32>
    %25 = vector.shape_cast %24 : vector<32xf32> to vector<32x1xf32>
    %26 = tpu.concatenate %17, %19, %22, %25 in 1 : vector<32x1xf32>, vector<32x1xf32>, vector<32x1xf32>, vector<32x1xf32> -> vector<32x4xf32>
    %27 = arith.addf %15, %26 : vector<32x4xf32>
    %c0_13 = arith.constant 0 : index
    %c0_14 = arith.constant 0 : index
    %28 = vector.load %arg5[%c0_13, %c0_14] : memref<32x4xf32, #tpu.memory_space<vmem>>, vector<32x4xf32>
    tpu.vector_store %arg5[%c0_13, %c0_14], %27 {strides = array<i32>} : memref<32x4xf32, #tpu.memory_space<vmem>>, vector<32x4xf32>,
    return
  }
  func.func @transform_0(%arg0: i32, %arg1: i32) -> (i32, i32) {
    %c0_i32 = arith.constant 0 : i32
    return %arg0, %arg1 : i32, i32
  }
  func.func @transform_1(%arg0: i32, %arg1: i32) -> (i32, i32) {
    %c0_i32 = arith.constant 0 : i32
    return %arg0, %arg1 : i32, i32
  }
  func.func @transform_2(%arg0: i32, %arg1: i32) -> (i32, i32) {
    %c0_i32 = arith.constant 0 : i32
    return %arg0, %arg1 : i32, i32
  }
  func.func @transform_3(%arg0: i32, %arg1: i32) -> (i32, i32) {
    %c0_i32 = arith.constant 0 : i32
    %c0_i32_0 = arith.constant 0 : i32
    return %arg0, %c0_i32 : i32, i32
  }
}

</mosaic_0001>

<bundles_post_ra>
// kernel: eval_measure.1
= control target key start
LH: loop header
LB: loop body
LE: loop exit
PB: predicated region body
PF: predicated region fallthrough
CT: control target
= control target key end

     0   :  { %s584_s12 = smov 0   ;;  %s586_s13 = smov 0   ;;  %s697_s0 = inlined_call_operand.vmem [shape: f32[64,32], index: 0, kind: input, shape index: {}]   ;;  %s698_s1 = inlined_call_operand.vmem [shape: f32[64,32], index: 1, kind: input, shape index: {}]   ;;  %s699_s2 = inlined_call_operand.vmem [shape: s32[64,32], index: 2, kind: input, shape index: {}]   ;;  %s700_s3 = inlined_call_operand.vmem [shape: f32[64,4], index: 3, kind: output, shape index: {}]  }
   0x1   :  { %s588_s14 = smov 0  }
   0x2 LB: > { %s25_s15 = sadd.s32 1, %s557_s13  ;;  %p499_p0 = scmp.ge.s32.totalorder %s561_s14, 1  ;;  %s561_s14 = sphi %s588_s14, %s13_s14   ;;  %s557_s13 = sphi %s586_s13, %s702_s13   ;;  %s553_s12 = sphi %s584_s12, %s701_s12  }
   0x3   : > { %p27_p1 = scmp.ge.s32.totalorder %s25_s15, 2  ;;  %p187_p2 = scmp.lt.s32.totalorder %s561_s14, 3 }
   0x5   : > { %s704_s15 = smov (%p27_p1, %s25_s15), 0  ;;  %p188_p3 = pnand %p499_p0, %p187_p2 }
   0x6   : > { %s500_s16 = sshll.u32 (!%p188_p3), %s553_s12, 2 }
   0x7   : > { %191 = sbr.rel (%p188_p3) target bundleno = 179 (0xb3), region = 32  ;;  %p231_p4 = scmp.lt.s32.totalorder (!%p188_p3), %s500_s16, 7 }
   0xc   : > { %s706_s16 = smov (!%p231_p4, %s500_s16), 7  ;;  %vm267_vm0 = vcmask 31744   ;;  %vm316_vm1 = vcmask 261120   ;;  %v563_v2 = vmov 0.0   ;;  %vm373_vm14 = vcmask 7168  }
   0xd   : > { %s602_s17 = sshll.u32 %s706_s16, 3  ;;  %vm378_vm15 = vcmask 15360  }
   0xe   : > { %s608_s20 = scalar_lea.vmem %s699_s2, %s602_s17  ;;  %s614_s23 = scalar_lea.vmem %s700_s3, %s602_s17 }
   0xf   : > { %v281_v0 = vld [vmem:[%s608_s20 + $0x8] sm:$0xff]  ;;  %v280_v1 = vld [vmem:[%s608_s20] sm:$0xff]  ;;  %s622_s26 = scalar_lea.vmem %s697_s0, %s602_s17  ;;  %268 = vst.msk [vmem:[%s614_s23] sm:$0xff] %vm267_vm0, %v563_v2  ;;  %s642_s29 = scalar_lea.vmem %s698_s1, %s602_s17  ;;  %v282_v18 = vld [vmem:[%s608_s20 + $0x10] sm:$0xff] }
  0x10   : > { %v285_v3 = vcvt.s32.f32 %v281_v0  ;;  %v284_v4 = vcvt.s32.f32 %v280_v1  ;;  %269 = vst.msk [vmem:[%s614_s23 + $0x8] sm:$0xff] %vm267_vm0, %v563_v2  ;;  %v274_v5 = vld [vmem:[%s622_s26 + $0x10] sm:$0xff]  ;;  %v273_v6 = vld [vmem:[%s622_s26 + $0x8] sm:$0xff]  ;;  %v272_v7 = vld [vmem:[%s622_s26] sm:$0xff]  ;;  %v286_v21 = vcvt.s32.f32 %v282_v18 }
  0x11   : > { %270 = vst.msk [vmem:[%s614_s23 + $0x10] sm:$0xff] %vm267_vm0, %v563_v2  ;;  %vm290_vm2 = vcmp.ge.f32.partialorder %v274_v5, 1.0  ;;  %vm294_vm3 = vcmp.lt.f32.partialorder %v274_v5, 2.0  ;;  %vm289_vm4 = vcmp.ge.f32.partialorder %v273_v6, 1.0  ;;  %vm293_vm5 = vcmp.lt.f32.partialorder %v273_v6, 2.0  ;;  %v276_v15 = vld [vmem:[%s642_s29] sm:$0xff] }
  0x12   : > { %v332_v8 = vsel %vm316_vm1, %v285_v3, 0.0  ;;  %v329_v9 = vsel %vm316_vm1, %v284_v4, 0.0  ;;  %271 = vst.msk [vmem:[%s614_s23 + $0x18] sm:$0xff] %vm267_vm0, %v563_v2  ;;  %vm298_vm6 = vmand %vm290_vm2, %vm294_vm3  ;;  %vm288_vm7 = vcmp.ge.f32.partialorder %v272_v7, 1.0  ;;  %vm292_vm8 = vcmp.lt.f32.partialorder %v272_v7, 2.0  ;;  %v275_v23 = vld [vmem:[%s622_s26 + $0x18] sm:$0xff] }
  0x13   : > { %333 = vadd.xlane.f32.xlu1 %v332_v8  ;;  %330 = vadd.xlane.f32.xlu0 %v329_v9  ;;  %v510_v10 = vsel %vm298_vm6, 1.0, %v563_v2  ;;  %vm297_vm9 = vmand %vm289_vm4, %vm293_vm5  ;;  %v308_v20 = vsub.f32 %v276_v15, %v272_v7  ;;  %vm291_vm11 = vcmp.ge.f32.partialorder %v275_v23, 1.0  ;;  %vm295_vm12 = vcmp.lt.f32.partialorder %v275_v23, 2.0  ;;  %v283_v27 = vld [vmem:[%s608_s20 + $0x18] sm:$0xff]  ;;  %v277_v31 = vld [vmem:[%s642_s29 + $0x8] sm:$0xff] }
  0x14   : > { %v323_v11 = vsel %vm316_vm1, %v510_v10, 0.0  ;;  %vm296_vm10 = vmand %vm288_vm7, %vm292_vm8  ;;  %v509_v12 = vsel %vm297_vm9, 1.0, %v563_v2  ;;  %v335_v26 = vsel %vm316_vm1, %v286_v21, 0.0  ;;  %v287_v29 = vcvt.s32.f32 %v283_v27  ;;  %v278_v33 = vld [vmem:[%s642_s29 + $0x10] sm:$0xff]  ;;  %v279_v41 = vld [vmem:[%s642_s29 + $0x18] sm:$0xff] }
  0x15   : > { %324 = vadd.xlane.f32.xlu2 %v323_v11  ;;  %v508_v13 = vsel %vm296_vm10, 1.0, %v563_v2  ;;  %v320_v16 = vsel %vm316_vm1, %v509_v12, 0.0  ;;  %v342_v22 = vmul.f32 %v509_v12, %v285_v3  ;;  %v357_v24 = vmul.f32 %v308_v20, %v308_v20  ;;  %vm299_vm13 = vmand %vm291_vm11, %vm295_vm12 }
  0x16   : > { %v341_v14 = vmul.f32 %v508_v13, %v284_v4  ;;  %v317_v17 = vsel %vm316_vm1, %v508_v13, 0.0  ;;  %v511_v30 = vsel %vm299_vm13, 1.0, %v563_v2  ;;  %v343_v32 = vmul.f32 %v510_v10, %v286_v21  ;;  %v312_v58 = vld [vmem:[%s614_s23] sm:$0xff] }
  0x17   : > { %v348_v25 = vsel %vm316_vm1, %v342_v22, 0.0  ;;  %v361_v28 = vsel %vm316_vm1, %v357_v24, 0.0  ;;  %v338_v34 = vsel %vm316_vm1, %v287_v29, 0.0  ;;  %v326_v35 = vsel %vm316_vm1, %v511_v30, 0.0  ;;  %v313_v62 = vld [vmem:[%s614_s23 + $0x8] sm:$0xff] }
  0x18   : > { %v345_v19 = vsel %vm316_vm1, %v341_v14, 0.0  ;;  %v309_v36 = vsub.f32 %v277_v31, %v273_v6  ;;  %v351_v37 = vsel %vm316_vm1, %v343_v32, 0.0  ;;  %v310_v38 = vsub.f32 %v278_v33, %v274_v5  ;;  %v314_v63 = vld [vmem:[%s614_s23 + $0x10] sm:$0xff] }
  0x19   : > { %v344_v39 = vmul.f32 %v511_v30, %v287_v29  ;;  %v311_v45 = vsub.f32 %v279_v41, %v275_v23  ;;  %vm383_vm2 = vcmask 23552   ;;  %v315_v0 = vld [vmem:[%s614_s23 + $0x18] sm:$0xff] }
  0x1a   : > { %v358_v40 = vmul.f32 %v309_v36, %v309_v36  ;;  %v359_v42 = vmul.f32 %v310_v38, %v310_v38 }
  0x1b   : > { %321 = vadd.xlane.f32.xlu1 %v320_v16  ;;  %318 = vadd.xlane.f32.xlu0 %v317_v17  ;;  %v354_v43 = vsel %vm316_vm1, %v344_v39, 0.0  ;;  %v360_v47 = vmul.f32 %v311_v45, %v311_v45 }
  0x1c   : > { %v364_v44 = vsel %vm316_vm1, %v358_v40, 0.0  ;;  %v367_v46 = vsel %vm316_vm1, %v359_v42, 0.0 }
  0x1d   : > { %346 = vadd.xlane.f32.xlu2 %v345_v19  ;;  %v370_v48 = vsel %vm316_vm1, %v360_v47, 0.0 }
  0x23   : > { %349 = vadd.xlane.f32.xlu1 %v348_v25  ;;  %336 = vadd.xlane.f32.xlu0 %v335_v26 }
  0x25   : > { %362 = vadd.xlane.f32.xlu2 %v361_v28 }
  0x2b   : > { %339 = vadd.xlane.f32.xlu1 %v338_v34  ;;  %327 = vadd.xlane.f32.xlu0 %v326_v35 }
  0x2d   : > { %352 = vadd.xlane.f32.xlu2 %v351_v37 }
  0x33   : > { %355 = vadd.xlane.f32.xlu1 %v354_v43  ;;  %365 = vadd.xlane.f32.xlu0 %v364_v44 }
  0x35   : > { %368 = vadd.xlane.f32.xlu2 %v367_v46 }
  0x3b   : > { %371 = vadd.xlane.f32.xlu0 %v370_v48 }
  0x86   : > { %v334_v49 = vpop.xlane.xlu1 %333  ;;  %v331_v50 = vpop.xlane.xlu0 %330 }
  0x88   : > { %v325_v51 = vpop.xlane.xlu2 %324 }
  0x8e   : > { %v322_v52 = vpop.xlane.xlu1 %321  ;;  %v319_v53 = vpop.xlane.xlu0 %318 }
  0x8f   : > { %v374_v55 = vsel %vm373_vm14, %v319_v53, %v331_v50  ;;  %v375_v5 = vsel %vm373_vm14, %v322_v52, %v334_v49 }
  0x90   : > { %v347_v54 = vpop.xlane.xlu2 %346 }
  0x91   : > { %v379_v59 = vsel %vm378_vm15, %v374_v55, %v347_v54 }
  0x96   : > { %v337_v56 = vpop.xlane.xlu0 %336  ;;  %v350_v57 = vpop.xlane.xlu1 %349 }
  0x97   : > { %v380_v6 = vsel %vm378_vm15, %v375_v5, %v350_v57  ;;  %v376_v8 = vsel %vm373_vm14, %v325_v51, %v337_v56 }
  0x98   : > { %v363_v60 = vpop.xlane.xlu2 %362 }
  0x99   : > { %v384_v61 = vsel %vm383_vm2, %v379_v59, %v363_v60 }
  0x9a   : > { %v388_v1 = vadd.f32 %v384_v61, %v312_v58 }
  0x9c   : > { %393 = vst.msk [vmem:[%s614_s23] sm:$0xff] %vm267_vm0, %v388_v1 }
  0x9e   : > { %v328_v2 = vpop.xlane.xlu0 %327  ;;  %v340_v4 = vpop.xlane.xlu1 %339 }
  0x9f   : > { %v377_v16 = vsel %vm373_vm14, %v328_v2, %v340_v4 }
  0xa0   : > { %v353_v3 = vpop.xlane.xlu2 %352 }
  0xa1   : > { %v381_v10 = vsel %vm378_vm15, %v376_v8, %v353_v3 }
  0xa6   : > { %v366_v7 = vpop.xlane.xlu0 %365  ;;  %v356_v15 = vpop.xlane.xlu1 %355 }
  0xa7   : > { %v385_v9 = vsel %vm383_vm2, %v380_v6, %v366_v7  ;;  %v382_v17 = vsel %vm378_vm15, %v377_v16, %v356_v15 }
  0xa8   : > { %v389_v11 = vadd.f32 %v385_v9, %v313_v62  ;;  %v369_v12 = vpop.xlane.xlu2 %368 }
  0xa9   : > { %v386_v13 = vsel %vm383_vm2, %v381_v10, %v369_v12 }
  0xaa   : > { %v390_v14 = vadd.f32 %v386_v13, %v314_v63  ;;  %394 = vst.msk [vmem:[%s614_s23 + $0x8] sm:$0xff] %vm267_vm0, %v389_v11 }
  0xac   : > { %395 = vst.msk [vmem:[%s614_s23 + $0x10] sm:$0xff] %vm267_vm0, %v390_v14 }
  0xae   : > { %v372_v18 = vpop.xlane.xlu0 %371 }
  0xaf   : > { %v387_v19 = vsel %vm383_vm2, %v382_v17, %v372_v18 }
  0xb0   : > { %v391_v20 = vadd.f32 %v387_v19, %v315_v0 }
  0xb2   : > { %396 = vst.msk [vmem:[%s614_s23 + $0x18] sm:$0xff] %vm267_vm0, %v391_v20 }
  0xb3 PF: > { %s13_s14 = sadd.s32 1, %s561_s14   ;;  %s701_s12 = smov %s557_s13 }
  0xb4   : > { %p10_p5 = scmp.ge.s32.totalorder %s13_s14, 4   ;;  %s702_s13 = smov %s704_s15 }
  0xb6   :  { %12 = sbr.rel (!%p10_p5) target bundleno = 2 (0x2), region = 72 }

</bundles_post_ra>
